<compile_context>
chip_gen: v7x
topology: tpu7x:2x2x1
jax: 0.10.0
libtpu: 0.0.40
codegen_flags: <defaults>
</compile_context>

<pallas_src>
import functools

import jax
import jax.numpy as jnp
from jax.experimental import pallas as pl
from jax.experimental.pallas import tpu as pltpu


def _round_up(n, m):
    return ((n + m - 1) // m) * m


def _pad2d(a, rows, cols):
    r, c = a.shape
    if r == rows and c == cols:
        return a
    return jnp.pad(a, ((0, rows - r), (0, cols - c)))


def _vmem_capacity_bytes():
    """Physical VMEM of the attached chip (128 MiB v5e/v6e, 64 MiB v7x)."""
    try:
        cap = getattr(pltpu.get_tpu_info(), "vmem_capacity_bytes", None)
        if cap:
            return int(cap)
    except Exception:
        pass
    return 64 << 20  # conservative fallback (v7x-sized)


# ---------------------------------------------------------------------------
# Kernel
# ---------------------------------------------------------------------------
def _discriminator_kernel(x_ref, w1_ref, b1_ref, w2_ref, b2_ref, w3_ref, b3_ref,
                          o_ref):
    # x tile: (tile_b, in_dim) f32, streamed unpadded; bf16 cast in-kernel.
    x = x_ref[...].astype(jnp.bfloat16)

    h1 = jnp.dot(x, w1_ref[...], preferred_element_type=jnp.float32) + b1_ref[...]
    h1 = jnp.tanh(h1)                                    # f32 tanh (EUP)

    h2 = jnp.dot(h1.astype(jnp.bfloat16), w2_ref[...],
                 preferred_element_type=jnp.float32) + b2_ref[...]
    h2 = jnp.tanh(h2)                                    # f32 tanh (EUP)

    out = jnp.dot(h2.astype(jnp.bfloat16), w3_ref[...],
                  preferred_element_type=jnp.float32) + b3_ref[...]
    o_ref[...] = out                                     # f32, lane-dense store


# ---------------------------------------------------------------------------
# Parameter preparation (call once; reuse across forward calls)
# ---------------------------------------------------------------------------
def prepare_params(params, *, compute_dtype=jnp.bfloat16):
    """Pad feature dims to multiples of 128 and cast weights to the MXU compute
    dtype.  Hoisted out of the per-call forward so weights are not re-read /
    re-written in HBM on every call.

    Accepts PyTorch-style biases of shape (f,) or (1, f).  Padding is
    mathematically inert: padded weight rows/cols and biases are zero and
    tanh(0) = 0; padded rows/cols are sliced off after the kernel.
    """
    w1, w2, w3 = params["w1"], params["w2"], params["w3"]
    b1 = jnp.reshape(params["b1"], (1, -1))
    b2 = jnp.reshape(params["b2"], (1, -1))
    b3 = jnp.reshape(params["b3"], (1, -1))

    in_dim, hid = w1.shape
    out_dim = w3.shape[1]
    hid_pad = _round_up(hid, 128)
    out_pad = _round_up(out_dim, 128)      # lane-dense output store

    return dict(
        w1=_pad2d(w1, in_dim, hid_pad).astype(compute_dtype),
        w2=_pad2d(w2, hid_pad, hid_pad).astype(compute_dtype),
        w3=_pad2d(w3, hid_pad, out_pad).astype(compute_dtype),
        b1=_pad2d(b1, 1, hid_pad).astype(jnp.float32),
        b2=_pad2d(b2, 1, hid_pad).astype(jnp.float32),
        b3=_pad2d(b3, 1, out_pad).astype(jnp.float32),
    )


# ---------------------------------------------------------------------------
# Forward
# ---------------------------------------------------------------------------
@functools.partial(jax.jit, static_argnames=("out_dim", "batch_tile"))
def discriminator_forward(x, prepped, out_dim, batch_tile=None):
    """x: (B, in_dim) float32; prepped: output of prepare_params().

    Returns (B, out_dim) float32, matching
      tanh(x @ w1 + b1) -> tanh(. @ w2 + b2) -> . @ w3 + b3
    """
    B, in_dim = x.shape
    hid_pad = prepped["w1"].shape[1]
    out_pad = prepped["w3"].shape[1]
    assert prepped["w1"].shape[0] == in_dim

    # ---- batch tiling -------------------------------------------------------
    # v5e/v6e (single TensorCore): the grid is a serial loop (~0.35 us/step), so
    # small/medium batches run as ONE grid step.  Large batches use 512-row
    # tiles (multiple of 256 => full MXU row passes) with deeper input buffering.
    if batch_tile is None:
        batch_tile = _round_up(B, 8) if B <= 1024 else 512
    b_pad = _round_up(max(B, batch_tile), batch_tile)
    grid_steps = b_pad // batch_tile

    x_p = x if b_pad == B else jnp.pad(x, ((0, b_pad - B), (0, 0)))

    # ---- cost estimate & generation-aware VMEM budget ------------------------
    flops = 2 * b_pad * (in_dim * hid_pad + hid_pad * hid_pad + hid_pad * out_pad)
    transcendentals = 2 * b_pad * hid_pad
    weight_bytes = (prepped["w1"].size + prepped["w2"].size + prepped["w3"].size) * 2
    bias_bytes = (prepped["b1"].size + prepped["b2"].size + prepped["b3"].size) * 4
    bytes_accessed = x_p.size * 4 + weight_bytes + bias_bytes + b_pad * out_pad * 4
    cost = pl.CostEstimate(flops=flops, transcendentals=transcendentals,
                           bytes_accessed=bytes_accessed)

    n_in_buf = 3 if grid_steps >= 4 else 2          # deeper buffering for big B
    x_stream = n_in_buf * batch_tile * in_dim * 4
    out_stream = 2 * batch_tile * out_pad * 4
    act_bytes = 3 * batch_tile * hid_pad * 4        # h1/h2 f32 temporaries
    vmem_needed = weight_bytes + bias_bytes + x_stream + out_stream + act_bytes
    vmem_cap = int(0.8 * _vmem_capacity_bytes())    # headroom for compiler scratch
    vmem_limit = min(max(vmem_needed + (4 << 20), 16 << 20), vmem_cap)

    # Weights/biases: whole-array VMEM residents, loaded once (no block_shape /
    # index_map => not part of the double-buffered pipeline).
    resident = pl.BlockSpec(memory_space=pltpu.MemorySpace.VMEM)

    if grid_steps >= 4:
        x_spec = pl.BlockSpec((batch_tile, in_dim), lambda i: (i, 0),
                              pipeline_mode=pl.Buffered(3))
    else:
        x_spec = pl.BlockSpec((batch_tile, in_dim), lambda i: (i, 0))

    out_p = pl.pallas_call(
        _discriminator_kernel,
        out_shape=jax.ShapeDtypeStruct((b_pad, out_pad), jnp.float32),
        grid_spec=pltpu.PrefetchScalarGridSpec(
            num_scalar_prefetch=0,
            grid=(grid_steps,),
            in_specs=[
                x_spec,     # x tile (batch_tile, in_dim), streamed
                resident,   # w1
                resident,   # b1
                resident,   # w2
                resident,   # b2
                resident,   # w3
                resident,   # b3
            ],
            out_specs=pl.BlockSpec((batch_tile, out_pad), lambda i: (i, 0)),
        ),
        compiler_params=pltpu.CompilerParams(
            dimension_semantics=("parallel",),
            vmem_limit_bytes=int(vmem_limit),
        ),
        cost_estimate=cost,
    )(x_p, prepped["w1"], prepped["b1"], prepped["w2"], prepped["b2"],
      prepped["w3"], prepped["b3"])

    # Padded batch rows / feature cols are sliced off here (the padded rows do
    # produce nonzero values in-kernel from the biases; this slice masks them).
    return out_p[:B, :out_dim]


# ---------------------------------------------------------------------------
# Reference / init / test
# ---------------------------------------------------------------------------
def init_params(key, in_dim, out_dim, hid_dim):
    """PyTorch-Linear-style init: U(-1/sqrt(fan_in), +1/sqrt(fan_in)); biases
    kept in PyTorch's (fan_out,) shape to exercise prepare_params robustness."""
    def linear(k, fan_in, fan_out):
        kw, kb = jax.random.split(k)
        bound = 1.0 / jnp.sqrt(jnp.float32(fan_in))
        w = jax.random.uniform(kw, (fan_in, fan_out), jnp.float32, -bound, bound)
        b = jax.random.uniform(kb, (fan_out,), jnp.float32, -bound, bound)
        return w, b

    k1, k2, k3 = jax.random.split(key, 3)
    w1, b1 = linear(k1, in_dim, hid_dim)
    w2, b2 = linear(k2, hid_dim, hid_dim)
    w3, b3 = linear(k3, hid_dim, out_dim)
    return dict(w1=w1, b1=b1, w2=w2, b2=b2, w3=w3, b3=b3)


def _reference(x, p):
    h1 = jnp.tanh(x @ p["w1"] + jnp.reshape(p["b1"], (1, -1)))
    h2 = jnp.tanh(h1 @ p["w2"] + jnp.reshape(p["b2"], (1, -1)))
    return h2 @ p["w3"] + jnp.reshape(p["b3"], (1, -1))


if __name__ == "__main__":
    key = jax.random.PRNGKey(0)
    kx, kp = jax.random.split(key)

    # Small shapes consistent with the module (PyTorch default hid_dim=50).
    batch, in_dim, hid_dim, out_dim = 256, 8, 50, 1
    x = jax.random.normal(kx, (batch, in_dim), jnp.float32)
    params = init_params(kp, in_dim, out_dim, hid_dim)

    prepped = prepare_params(params)          # once; reused across forward calls
    out = jax.block_until_ready(discriminator_forward(x, prepped, out_dim))

    ref = _reference(x, params)
    assert out.shape == (batch, out_dim), out.shape
    # bf16 matmul inputs with f32 accumulation -> loosened tolerance vs f32 ref.
    assert jnp.allclose(out, ref, atol=2e-2, rtol=2e-2), "mismatch vs reference"

    print("KERNEL_OK")
</pallas_src>

<mosaic_0001>
module attributes {stable_mosaic.version = 11 : i64} {
  func.func @_discriminator_kernel(%arg0: i32, %arg1: memref<256x8xf32, #tpu.memory_space<vmem>>, %arg2: memref<8x128xbf16, #tpu.memory_space<vmem>>, %arg3: memref<1x128xf32, #tpu.memory_space<vmem>>, %arg4: memref<128x128xbf16, #tpu.memory_space<vmem>>, %arg5: memref<1x128xf32, #tpu.memory_space<vmem>>, %arg6: memref<128x128xbf16, #tpu.memory_space<vmem>>, %arg7: memref<1x128xf32, #tpu.memory_space<vmem>>, %arg8: memref<256x128xf32, #tpu.memory_space<vmem>>) attributes {dimension_semantics = [#tpu.dimension_semantics<parallel>], iteration_bounds = array<i64: 1>, scalar_prefetch = 0 : i64, scratch_operands = 0 : i64, tpu.core_type = #tpu.core_type<tc>, window_params = [{transform_indices = @transform_0, window_bounds = array<i64: 256, 8>}, {pipeline_mode = #tpu.pipeline_mode<synchronous>, transform_indices = @transform_1, window_bounds = array<i64: 8, 128>}, {pipeline_mode = #tpu.pipeline_mode<synchronous>, transform_indices = @transform_2, window_bounds = array<i64: 1, 128>}, {pipeline_mode = #tpu.pipeline_mode<synchronous>, transform_indices = @transform_3, window_bounds = array<i64: 128, 128>}, {pipeline_mode = #tpu.pipeline_mode<synchronous>, transform_indices = @transform_4, window_bounds = array<i64: 1, 128>}, {pipeline_mode = #tpu.pipeline_mode<synchronous>, transform_indices = @transform_5, window_bounds = array<i64: 128, 128>}, {pipeline_mode = #tpu.pipeline_mode<synchronous>, transform_indices = @transform_6, window_bounds = array<i64: 1, 128>}, {transform_indices = @transform_7, window_bounds = array<i64: 256, 128>}]} {
    %c0 = arith.constant 0 : index
    %c0_0 = arith.constant 0 : index
    %0 = vector.load %arg1[%c0, %c0_0] : memref<256x8xf32, #tpu.memory_space<vmem>>, vector<256x8xf32>
    %1 = arith.truncf %0 : vector<256x8xf32> to vector<256x8xbf16>
    %c0_1 = arith.constant 0 : index
    %c0_2 = arith.constant 0 : index
    %2 = vector.load %arg2[%c0_1, %c0_2] : memref<8x128xbf16, #tpu.memory_space<vmem>>, vector<8x128xbf16>
    %cst = arith.constant dense<0.000000e+00> : vector<256x128xf32>
    %3 = tpu.matmul %1, %2, %cst {dimension_numbers = #tpu.dot_dimension_numbers<[1], [0], [0], [1], [0, 0, 1, 1], [], []>} : vector<256x8xbf16>, vector<8x128xbf16>, vector<256x128xf32> -> vector<256x128xf32>
    %c0_3 = arith.constant 0 : index
    %c0_4 = arith.constant 0 : index
    %4 = vector.load %arg3[%c0_3, %c0_4] : memref<1x128xf32, #tpu.memory_space<vmem>>, vector<1x128xf32>
    %5 = vector.broadcast %4 : vector<1x128xf32> to vector<256x128xf32>
    %6 = arith.addf %3, %5 : vector<256x128xf32>
    %7 = math.tanh %6 : vector<256x128xf32>
    %8 = arith.truncf %7 : vector<256x128xf32> to vector<256x128xbf16>
    %c0_5 = arith.constant 0 : index
    %c0_6 = arith.constant 0 : index
    %9 = vector.load %arg4[%c0_5, %c0_6] : memref<128x128xbf16, #tpu.memory_space<vmem>>, vector<128x128xbf16>
    %cst_7 = arith.constant dense<0.000000e+00> : vector<256x128xf32>
    %10 = tpu.matmul %8, %9, %cst_7 {dimension_numbers = #tpu.dot_dimension_numbers<[1], [0], [0], [1], [0, 0, 1, 1], [], []>} : vector<256x128xbf16>, vector<128x128xbf16>, vector<256x128xf32> -> vector<256x128xf32>
    %c0_8 = arith.constant 0 : index
    %c0_9 = arith.constant 0 : index
    %11 = vector.load %arg5[%c0_8, %c0_9] : memref<1x128xf32, #tpu.memory_space<vmem>>, vector<1x128xf32>
    %12 = vector.broadcast %11 : vector<1x128xf32> to vector<256x128xf32>
    %13 = arith.addf %10, %12 : vector<256x128xf32>
    %14 = math.tanh %13 : vector<256x128xf32>
    %15 = arith.truncf %14 : vector<256x128xf32> to vector<256x128xbf16>
    %c0_10 = arith.constant 0 : index
    %c0_11 = arith.constant 0 : index
    %16 = vector.load %arg6[%c0_10, %c0_11] : memref<128x128xbf16, #tpu.memory_space<vmem>>, vector<128x128xbf16>
    %cst_12 = arith.constant dense<0.000000e+00> : vector<256x128xf32>
    %17 = tpu.matmul %15, %16, %cst_12 {dimension_numbers = #tpu.dot_dimension_numbers<[1], [0], [0], [1], [0, 0, 1, 1], [], []>} : vector<256x128xbf16>, vector<128x128xbf16>, vector<256x128xf32> -> vector<256x128xf32>
    %c0_13 = arith.constant 0 : index
    %c0_14 = arith.constant 0 : index
    %18 = vector.load %arg7[%c0_13, %c0_14] : memref<1x128xf32, #tpu.memory_space<vmem>>, vector<1x128xf32>
    %19 = vector.broadcast %18 : vector<1x128xf32> to vector<256x128xf32>
    %20 = arith.addf %17, %19 : vector<256x128xf32>
    %c0_15 = arith.constant 0 : index
    %c0_16 = arith.constant 0 : index
    %21 = vector.load %arg8[%c0_15, %c0_16] : memref<256x128xf32, #tpu.memory_space<vmem>>, vector<256x128xf32>
    tpu.vector_store %arg8[%c0_15, %c0_16], %20 {strides = array<i32>} : memref<256x128xf32, #tpu.memory_space<vmem>>, vector<256x128xf32>,
    return
  }
  func.func @transform_0(%arg0: i32) -> (i32, i32) {
    %c0_i32 = arith.constant 0 : i32
    %c0_i32_0 = arith.constant 0 : i32
    return %arg0, %c0_i32 : i32, i32
  }
  func.func @transform_1(%arg0: i32) -> (i32, i32) {
    %c0_i32 = arith.constant 0 : i32
    %c0_i32_0 = arith.constant 0 : i32
    %c0_i32_1 = arith.constant 0 : i32
    return %c0_i32, %c0_i32_0 : i32, i32
  }
  func.func @transform_2(%arg0: i32) -> (i32, i32) {
    %c0_i32 = arith.constant 0 : i32
    %c0_i32_0 = arith.constant 0 : i32
    %c0_i32_1 = arith.constant 0 : i32
    return %c0_i32, %c0_i32_0 : i32, i32
  }
  func.func @transform_3(%arg0: i32) -> (i32, i32) {
    %c0_i32 = arith.constant 0 : i32
    %c0_i32_0 = arith.constant 0 : i32
    %c0_i32_1 = arith.constant 0 : i32
    return %c0_i32, %c0_i32_0 : i32, i32
  }
  func.func @transform_4(%arg0: i32) -> (i32, i32) {
    %c0_i32 = arith.constant 0 : i32
    %c0_i32_0 = arith.constant 0 : i32
    %c0_i32_1 = arith.constant 0 : i32
    return %c0_i32, %c0_i32_0 : i32, i32
  }
  func.func @transform_5(%arg0: i32) -> (i32, i32) {
    %c0_i32 = arith.constant 0 : i32
    %c0_i32_0 = arith.constant 0 : i32
    %c0_i32_1 = arith.constant 0 : i32
    return %c0_i32, %c0_i32_0 : i32, i32
  }
  func.func @transform_6(%arg0: i32) -> (i32, i32) {
    %c0_i32 = arith.constant 0 : i32
    %c0_i32_0 = arith.constant 0 : i32
    %c0_i32_1 = arith.constant 0 : i32
    return %c0_i32, %c0_i32_0 : i32, i32
  }
  func.func @transform_7(%arg0: i32) -> (i32, i32) {
    %c0_i32 = arith.constant 0 : i32
    %c0_i32_0 = arith.constant 0 : i32
    return %arg0, %c0_i32 : i32, i32
  }
}

</mosaic_0001>

<bundles_post_ra>
// kernel: discriminator_forward.1
= control target key start
LH: loop header
LB: loop body
LE: loop exit
PB: predicated region body
PF: predicated region fallthrough
CT: control target
= control target key end

     0   :  { %vm132_vm0 = vcmask 1043456   ;;  %vm83_vm1 = vcmask 64512   ;;  %s1699_s1 = inlined_call_operand.vmem [shape: bf16[8,128], index: 1, kind: input, shape index: {}]   ;;  %s1700_s0 = inlined_call_operand.vmem [shape: f32[256,8], index: 0, kind: input, shape index: {}]   ;;  %s1701_s3 = inlined_call_operand.vmem [shape: bf16[128,128], index: 3, kind: input, shape index: {}]   ;;  %s1702_s5 = inlined_call_operand.vmem [shape: bf16[128,128], index: 5, kind: input, shape index: {}]   ;;  %s1703_s2 = inlined_call_operand.vmem [shape: f32[1,128], index: 2, kind: input, shape index: {}]   ;;  %s1704_s4 = inlined_call_operand.vmem [shape: f32[1,128], index: 4, kind: input, shape index: {}]   ;;  %s1705_s6 = inlined_call_operand.vmem [shape: f32[1,128], index: 6, kind: input, shape index: {}]   ;;  %s1706_s7 = inlined_call_operand.vmem [shape: f32[256,128], index: 7, kind: output, shape index: {}]  }
   0x1   :  { %v75_v0 = vld [vmem:[%s1699_s1] sm:$0xf]  ;;  %v28_v2 = vld [vmem:[%s1700_s0 + $0x8] sm:$0xff]  ;;  %v29_v5 = vld [vmem:[%s1700_s0 + $0x10] sm:$0xff] }
   0x2   :  { %v27_v1 = vld [vmem:[%s1700_s0] sm:$0xff]  ;;  %1125 = vmatprep.subr.msk.bf16.mxu0 %vm132_vm0, %v75_v0  ;;  %v134_v3 = vsel %vm132_vm0, %v75_v0, 0  ;;  %v30_v6 = vld [vmem:[%s1700_s0 + $0x18] sm:$0xff]  ;;  %1126 = vmatprep.subr.msk.bf16.mxu1 %vm132_vm0, %v75_v0  ;;  %v32_v9 = vld [vmem:[%s1700_s0 + $0x28] sm:$0xff] }
   0x3   :  { %v59_v4 = vpack.c.bf16 %v28_v2, %v27_v1  ;;  %v31_v7 = vld [vmem:[%s1700_s0 + $0x20] sm:$0xff]  ;;  %994 = vmatpush3.bf16.msra.mxu0 %v134_v3  ;;  %v60_v8 = vpack.c.bf16 %v30_v6, %v29_v5  ;;  %1124 = vmatpush3.bf16.msra.mxu1 %v134_v3  ;;  %v33_v11 = vld [vmem:[%s1700_s0 + $0x30] sm:$0xff]  ;;  %v34_v12 = vld [vmem:[%s1700_s0 + $0x38] sm:$0xff] }
   0x4   :  { %v61_v10 = vpack.c.bf16 %v32_v9, %v31_v7  ;;  %v35_v13 = vld [vmem:[%s1700_s0 + $0x40] sm:$0xff]  ;;  %v44_v15 = vld [vmem:[%s1700_s0 + $0x88] sm:$0xff]  ;;  %v45_v16 = vld [vmem:[%s1700_s0 + $0x90] sm:$0xff]  ;;  %v62_v24 = vpack.c.bf16 %v34_v12, %v33_v11 }
   0x5   :  { %995 = vmatprep.mubr.msk.bf16.mxu0 %vm83_vm1, %v59_v4  ;;  %v43_v14 = vld [vmem:[%s1700_s0 + $0x80] sm:$0xff]  ;;  %v46_v17 = vld [vmem:[%s1700_s0 + $0x98] sm:$0xff]  ;;  %v36_v18 = vld [vmem:[%s1700_s0 + $0x48] sm:$0xff] }
   0x6   :  { %996 = vmatmul.mubr.msk.bf16.vlgmr.msra.gmra.mrb[0].mxu0 %vm83_vm1, %v60_v8  ;;  %v67_v19 = vpack.c.bf16 %v44_v15, %v43_v14  ;;  %v68_v20 = vpack.c.bf16 %v46_v17, %v45_v16  ;;  %v47_v21 = vld [vmem:[%s1700_s0 + $0xa0] sm:$0xff]  ;;  %v48_v22 = vld [vmem:[%s1700_s0 + $0xa8] sm:$0xff]  ;;  %v49_v25 = vld [vmem:[%s1700_s0 + $0xb0] sm:$0xff]  ;;  %v63_v26 = vpack.c.bf16 %v36_v18, %v35_v13 }
   0x7   :  { %999 = vmatprep.mubr.msk.bf16.mxu0 %vm83_vm1, %v61_v10  ;;  %v69_v23 = vpack.c.bf16 %v48_v22, %v47_v21  ;;  %v50_v27 = vld [vmem:[%s1700_s0 + $0xb8] sm:$0xff]  ;;  %v51_v28 = vld [vmem:[%s1700_s0 + $0xc0] sm:$0xff]  ;;  %v52_v29 = vld [vmem:[%s1700_s0 + $0xc8] sm:$0xff] }
   0x8   :  { %1011 = vmatprep.mubr.msk.bf16.mxu1 %vm83_vm1, %v67_v19  ;;  %v1127_v30 = vld [vmem:[%s1701_s3] sm:$0xff]   ;;  %v37_v31 = vld [vmem:[%s1700_s0 + $0x50] sm:$0xff]  ;;  %v38_v32 = vld [vmem:[%s1700_s0 + $0x58] sm:$0xff]  ;;  %v70_v36 = vpack.c.bf16 %v50_v27, %v49_v25  ;;  %v71_v38 = vpack.c.bf16 %v52_v29, %v51_v28 }
   0x9   :  { %1012 = vmatmul.mubr.msk.bf16.vlgmr.msra.gmra.mrb[0].mxu1 %vm83_vm1, %v68_v20  ;;  %v1128_v33 = vld [vmem:[%s1701_s3 + $0x8] sm:$0xff]   ;;  %v39_v34 = vld [vmem:[%s1700_s0 + $0x60] sm:$0xff]  ;;  %1027 = vmatprep.subr.bf16.mxu1 %v1127_v30  ;;  %v1129_v37 = vld [vmem:[%s1701_s3 + $0x10] sm:$0xff]   ;;  %v64_v39 = vpack.c.bf16 %v38_v32, %v37_v31 }
   0xa   :  { %1015 = vmatprep.mubr.msk.bf16.mxu1 %vm83_vm1, %v69_v23  ;;  %v40_v35 = vld [vmem:[%s1700_s0 + $0x68] sm:$0xff]  ;;  %1028 = vmatpush3.bf16.msra.mxu1 %v1127_v30  ;;  %v53_v41 = vld [vmem:[%s1700_s0 + $0xd0] sm:$0xff]  ;;  %v54_v42 = vld [vmem:[%s1700_s0 + $0xd8] sm:$0xff] }
   0xb   :  { %1029 = vmatprep.subr.bf16.mxu1 %v1128_v33  ;;  %v65_v40 = vpack.c.bf16 %v40_v35, %v39_v34  ;;  %v55_v43 = vld [vmem:[%s1700_s0 + $0xe0] sm:$0xff]  ;;  %v56_v44 = vld [vmem:[%s1700_s0 + $0xe8] sm:$0xff]  ;;  %v1130_v45 = vld [vmem:[%s1701_s3 + $0x18] sm:$0xff]   ;;  %v72_v48 = vpack.c.bf16 %v54_v42, %v53_v41 }
   0xc   :  { %v41_v46 = vld [vmem:[%s1700_s0 + $0x70] sm:$0xff]  ;;  %v42_v47 = vld [vmem:[%s1700_s0 + $0x78] sm:$0xff]  ;;  %v73_v49 = vpack.c.bf16 %v56_v44, %v55_v43  ;;  %v1131_v54 = vld [vmem:[%s1701_s3 + $0x20] sm:$0xff]  }
   0xd   :  { %v66_v50 = vpack.c.bf16 %v42_v47, %v41_v46  ;;  %v57_v51 = vld [vmem:[%s1700_s0 + $0xf0] sm:$0xff]  ;;  %v58_v52 = vld [vmem:[%s1700_s0 + $0xf8] sm:$0xff]  ;;  %v1132_v55 = vld [vmem:[%s1701_s3 + $0x28] sm:$0xff]  }
   0xe   :  { %1000 = vmatmul.mubr.msk.bf16.gmra.mrb[4].mxu0 %vm83_vm1, %v62_v24  ;;  %1030 = vmatpush3.bf16.msra.mxu1 %v1128_v33  ;;  %v74_v53 = vpack.c.bf16 %v58_v52, %v57_v51  ;;  %v1133_v56 = vld [vmem:[%s1701_s3 + $0x30] sm:$0xff]   ;;  %v1134_v57 = vld [vmem:[%s1701_s3 + $0x38] sm:$0xff]   ;;  %v1135_v58 = vld [vmem:[%s1702_s5] sm:$0xff]  }
   0xf   :  { %1003 = vmatprep.mubr.msk.bf16.mxu0 %vm83_vm1, %v63_v26  ;;  %1031 = vmatprep.subr.bf16.mxu1 %v1129_v37  ;;  %v1136_v59 = vld [vmem:[%s1702_s5 + $0x8] sm:$0xff]   ;;  %v1137_v60 = vld [vmem:[%s1702_s5 + $0x10] sm:$0xff]   ;;  %v1138_v61 = vld [vmem:[%s1702_s5 + $0x18] sm:$0xff]  }
  0x10   :  { %1075 = vmatprep.subr.bf16.mxu0 %v1135_v58  ;;  %v1465_v62 = vld [vmem:[%s1703_s2] ss:$0 sm:$0xff] }
  0x11   :  { %1016 = vmatmul.mubr.msk.bf16.gmra.mrb[4].mxu1 %vm83_vm1, %v70_v36  ;;  %1076 = vmatpush3.bf16.msra.mxu0 %v1135_v58 }
  0x12   :  { %1019 = vmatprep.mubr.msk.bf16.mxu1 %vm83_vm1, %v71_v38  ;;  %1032 = vmatpush3.bf16.msra.mxu1 %v1129_v37 }
  0x13   :  { %1033 = vmatprep.subr.bf16.mxu1 %v1130_v45  ;;  %1077 = vmatprep.subr.bf16.mxu0 %v1136_v59 }
  0x15   :  { %1078 = vmatpush3.bf16.msra.mxu0 %v1136_v59 }
  0x16   :  { %1004 = vmatmul.mubr.msk.bf16.gmra.mrb[8].mxu0 %vm83_vm1, %v64_v39  ;;  %1034 = vmatpush3.bf16.msra.mxu1 %v1130_v45 }
  0x17   :  { %1007 = vmatprep.mubr.msk.bf16.mxu0 %vm83_vm1, %v65_v40  ;;  %1035 = vmatprep.subr.bf16.mxu1 %v1131_v54 }
  0x18   :  { %1079 = vmatprep.subr.bf16.mxu0 %v1137_v60 }
  0x19   :  { %1020 = vmatmul.mubr.msk.bf16.gmra.mrb[8].mxu1 %vm83_vm1, %v72_v48  ;;  %1080 = vmatpush3.bf16.msra.mxu0 %v1137_v60 }
  0x1a   :  { %1023 = vmatprep.mubr.msk.bf16.mxu1 %vm83_vm1, %v73_v49  ;;  %1036 = vmatpush3.bf16.msra.mxu1 %v1131_v54 }
  0x1b   :  { %1037 = vmatprep.subr.bf16.mxu1 %v1132_v55  ;;  %1081 = vmatprep.subr.bf16.mxu0 %v1138_v61 }
  0x1d   :  { %1082 = vmatpush3.bf16.msra.mxu0 %v1138_v61 }
  0x1e   :  { %1008 = vmatmul.mubr.msk.bf16.gmra.mrb[12].mxu0 %vm83_vm1, %v66_v50  ;;  %1038 = vmatpush3.bf16.msra.mxu1 %v1132_v55 }
  0x1f   :  { %1039 = vmatprep.subr.bf16.mxu1 %v1133_v56 }
  0x21   :  { %1024 = vmatmul.mubr.msk.bf16.gmra.mrb[12].mxu1 %vm83_vm1, %v74_v53 }
  0x22   :  { %1040 = vmatpush3.bf16.msra.mxu1 %v1133_v56 }
  0x23   :  { %1041 = vmatprep.subr.bf16.mxu1 %v1134_v57 }
  0x26   :  { %1042 = vmatpush3.bf16.msra.mxu1 %v1134_v57 }
  0xd9   :  { %v997_v63 = vpop.f32.mrb[0].mxu0 }
  0xda   :  { %v179_v0 = vadd.f32 %v997_v63, %v1465_v62  ;;  %v170_v1 = vpop.f32.mrb[1].mxu0 }
  0xdb   :  { %v171_v2 = vadd.f32 %v1465_v62, %v170_v1  ;;  %v998_v3 = vpop.f32.mrb[2].mxu0 }
  0xdc   :  { %1143 = vtanh.f32 %v179_v0  ;;  %v182_v4 = vadd.f32 %v998_v3, %v1465_v62  ;;  %v173_v5 = vpop.f32.mrb[3].mxu0  ;;  %v1013_v7 = vpop.f32.mrb[0].mxu1 }
  0xdd   :  { %1145 = vtanh.f32 %v171_v2  ;;  %v174_v6 = vadd.f32 %v1465_v62, %v173_v5  ;;  %v243_v8 = vadd.f32 %v1013_v7, %v1465_v62  ;;  %v234_v9 = vpop.f32.mrb[1].mxu1 }
  0xde   :  { %1147 = vtanh.f32 %v182_v4  ;;  %v235_v10 = vadd.f32 %v1465_v62, %v234_v9  ;;  %v1014_v11 = vpop.f32.mrb[2].mxu1 }
  0xdf   :  { %1149 = vtanh.f32 %v174_v6  ;;  %v246_v13 = vadd.f32 %v1014_v11, %v1465_v62  ;;  %v237_v14 = vpop.f32.mrb[3].mxu1 }
  0xe0   :  { %1151 = vtanh.f32 %v243_v8  ;;  %v238_v21 = vadd.f32 %v1465_v62, %v237_v14 }
  0xe1   :  { %v1001_v12 = vpop.f32.mrb[4].mxu0  ;;  %1153 = vtanh.f32 %v235_v10 }
  0xe2   :  { %v195_v15 = vadd.f32 %v1001_v12, %v1465_v62  ;;  %v186_v16 = vpop.f32.mrb[5].mxu0  ;;  %1155 = vtanh.f32 %v246_v13 }
  0xe3   :  { %v187_v17 = vadd.f32 %v1465_v62, %v186_v16  ;;  %v1002_v18 = vpop.f32.mrb[6].mxu0 }
  0xe4   :  { %1157 = vtanh.f32 %v195_v15  ;;  %v198_v19 = vadd.f32 %v1002_v18, %v1465_v62  ;;  %v189_v20 = vpop.f32.mrb[7].mxu0  ;;  %v1017_v24 = vpop.f32.mrb[4].mxu1 }
  0xe5   :  { %1159 = vtanh.f32 %v187_v17  ;;  %v190_v22 = vadd.f32 %v1465_v62, %v189_v20  ;;  %v259_v26 = vadd.f32 %v1017_v24, %v1465_v62  ;;  %v250_v27 = vpop.f32.mrb[5].mxu1 }
  0xe6   :  { %v1144_v23 = vpop.eup %1143  ;;  %1161 = vtanh.f32 %v198_v19  ;;  %v251_v29 = vadd.f32 %v1465_v62, %v250_v27  ;;  %v1018_v30 = vpop.f32.mrb[6].mxu1 }
  0xe7   :  { %v1146_v25 = vpop.eup %1145  ;;  %1163 = vtanh.f32 %v190_v22  ;;  %v262_v34 = vadd.f32 %v1018_v30, %v1465_v62  ;;  %v253_v35 = vpop.f32.mrb[7].mxu1 }
  0xe8   :  { %v1148_v28 = vpop.eup %1147  ;;  %1165 = vtanh.f32 %v238_v21  ;;  %v254_v45 = vadd.f32 %v1465_v62, %v253_v35 }
  0xe9   :  { %v1150_v31 = vpop.eup %1149  ;;  %v1005_v32 = vpop.f32.mrb[8].mxu0  ;;  %v330_v33 = vpack.c.bf16 %v1148_v28, %v1144_v23  ;;  %1167 = vtanh.f32 %v259_v26 }
  0xea   :  { %v211_v36 = vadd.f32 %v1005_v32, %v1465_v62  ;;  %v202_v37 = vpop.f32.mrb[9].mxu0  ;;  %v329_v38 = vpack.c.bf16 %v1150_v31, %v1146_v25  ;;  %1169 = vtanh.f32 %v251_v29  ;;  %v1483_v39 = vpop.eup %1151 }
  0xeb   :  { %v203_v40 = vadd.f32 %v1465_v62, %v202_v37  ;;  %v1006_v41 = vpop.f32.mrb[10].mxu0  ;;  %1171 = vtanh.f32 %v262_v34  ;;  %v1486_v42 = vpop.eup %1153 }
  0xec   :  { %1173 = vtanh.f32 %v211_v36  ;;  %v214_v43 = vadd.f32 %v1006_v41, %v1465_v62  ;;  %v205_v44 = vpop.f32.mrb[11].mxu0  ;;  %1043 = vmatprep.mubr.bf16.mxu1 %v329_v38  ;;  %v1490_v46 = vpop.eup %1155 }
  0xed   :  { %1175 = vtanh.f32 %v203_v40  ;;  %v206_v47 = vadd.f32 %v1465_v62, %v205_v44  ;;  %1044 = vmatmul.mubr.bf16.vlgmr.msra.gmra.mrb[16].mxu1 %v330_v33  ;;  %v1021_v49 = vpop.f32.mrb[8].mxu1  ;;  %v338_v50 = vpack.c.bf16 %v1490_v46, %v1483_v39  ;;  %v1141_v39 = vld [vmem:[%s1702_s5 + $0x30] sm:$0xff]   ;;  %v1142_v46 = vld [vmem:[%s1702_s5 + $0x38] sm:$0xff]  }
  0xee   :  { %v1158_v48 = vpop.eup %1157  ;;  %1177 = vtanh.f32 %v214_v43  ;;  %v275_v52 = vadd.f32 %v1021_v49, %v1465_v62  ;;  %v266_v53 = vpop.f32.mrb[9].mxu1  ;;  %v1139_v49 = vld [vmem:[%s1702_s5 + $0x20] sm:$0xff]  }
  0xef   :  { %v1160_v51 = vpop.eup %1159  ;;  %1179 = vtanh.f32 %v206_v47  ;;  %v267_v55 = vadd.f32 %v1465_v62, %v266_v53  ;;  %v1022_v56 = vpop.f32.mrb[10].mxu1  ;;  %1083 = vmatprep.subr.bf16.mxu0 %v1139_v49 }
  0xf0   :  { %v1162_v54 = vpop.eup %1161  ;;  %1181 = vtanh.f32 %v254_v45  ;;  %v278_v60 = vadd.f32 %v1022_v56, %v1465_v62  ;;  %v269_v61 = vpop.f32.mrb[11].mxu1  ;;  %1084 = vmatpush3.bf16.msra.mxu0 %v1139_v49 }
  0xf1   :  { %v1164_v57 = vpop.eup %1163  ;;  %v1009_v58 = vpop.f32.mrb[12].mxu0  ;;  %v332_v59 = vpack.c.bf16 %v1162_v54, %v1158_v48  ;;  %1183 = vtanh.f32 %v275_v52  ;;  %v270_v10 = vadd.f32 %v1465_v62, %v269_v61 }
  0xf2   :  { %v1498_v63 = vpop.eup %1165  ;;  %v227_v0 = vadd.f32 %v1009_v58, %v1465_v62  ;;  %v218_v1 = vpop.f32.mrb[13].mxu0  ;;  %v331_v2 = vpack.c.bf16 %v1164_v57, %v1160_v51  ;;  %1185 = vtanh.f32 %v267_v55  ;;  %v1140_v51 = vld [vmem:[%s1702_s5 + $0x28] sm:$0xff]  }
  0xf3   :  { %v1501_v3 = vpop.eup %1167  ;;  %v219_v4 = vadd.f32 %v1465_v62, %v218_v1  ;;  %v1010_v5 = vpop.f32.mrb[14].mxu0  ;;  %1187 = vtanh.f32 %v278_v60  ;;  %v337_v6 = vpack.c.bf16 %v1498_v63, %v1486_v42  ;;  %1085 = vmatprep.subr.bf16.mxu0 %v1140_v51 }
  0xf4   :  { %v1170_v7 = vpop.eup %1169  ;;  %1189 = vtanh.f32 %v227_v0  ;;  %v230_v8 = vadd.f32 %v1010_v5, %v1465_v62  ;;  %v221_v9 = vpop.f32.mrb[15].mxu0  ;;  %1047 = vmatprep.mubr.bf16.mxu1 %v331_v2  ;;  %1086 = vmatpush3.bf16.msra.mxu0 %v1140_v51 }
  0xf5   :  { %v1172_v11 = vpop.eup %1171  ;;  %1191 = vtanh.f32 %v219_v4  ;;  %v222_v12 = vadd.f32 %v1465_v62, %v221_v9  ;;  %1048 = vmatmul.mubr.bf16.gmra.mrb[20].mxu1 %v332_v59  ;;  %v1025_v14 = vpop.f32.mrb[12].mxu1  ;;  %1087 = vmatprep.subr.bf16.mxu0 %v1141_v39 }
  0xf6   :  { %v1174_v13 = vpop.eup %1173  ;;  %1193 = vtanh.f32 %v230_v8  ;;  %v340_v15 = vpack.c.bf16 %v1172_v11, %v1501_v3  ;;  %v291_v17 = vadd.f32 %v1025_v14, %v1465_v62  ;;  %v282_v18 = vpop.f32.mrb[13].mxu1 }
  0xf7   :  { %v1176_v16 = vpop.eup %1175  ;;  %1195 = vtanh.f32 %v222_v12  ;;  %v283_v20 = vadd.f32 %v1465_v62, %v282_v18  ;;  %v1026_v21 = vpop.f32.mrb[14].mxu1 }
  0xf8   :  { %v1178_v19 = vpop.eup %1177  ;;  %1197 = vtanh.f32 %v270_v10  ;;  %v294_v24 = vadd.f32 %v1026_v21, %v1465_v62  ;;  %v285_v25 = vpop.f32.mrb[15].mxu1  ;;  %1088 = vmatpush3.bf16.msra.mxu0 %v1141_v39 }
  0xf9   :  { %v1180_v22 = vpop.eup %1179  ;;  %v334_v23 = vpack.c.bf16 %v1178_v19, %v1174_v13  ;;  %1199 = vtanh.f32 %v291_v17  ;;  %v286_v28 = vadd.f32 %v1465_v62, %v285_v25  ;;  %1089 = vmatprep.subr.bf16.mxu0 %v1142_v46 }
  0xfa   :  { %v1182_v26 = vpop.eup %1181  ;;  %v333_v27 = vpack.c.bf16 %v1180_v22, %v1176_v16  ;;  %1201 = vtanh.f32 %v283_v20 }
  0xfb   :  { %v1184_v29 = vpop.eup %1183  ;;  %1203 = vtanh.f32 %v294_v24  ;;  %v339_v30 = vpack.c.bf16 %v1182_v26, %v1170_v7 }
  0xfc   :  { %v1186_v31 = vpop.eup %1185  ;;  %1051 = vmatprep.mubr.bf16.mxu1 %v333_v27  ;;  %1205 = vtanh.f32 %v286_v28  ;;  %1090 = vmatpush3.bf16.msra.mxu0 %v1142_v46 }
  0xfd   :  { %v1188_v32 = vpop.eup %1187  ;;  %1052 = vmatmul.mubr.bf16.gmra.mrb[24].mxu1 %v334_v23 }
  0xfe   :  { %v1190_v33 = vpop.eup %1189  ;;  %v342_v34 = vpack.c.bf16 %v1188_v32, %v1184_v29 }
  0xff   :  { %v1192_v35 = vpop.eup %1191 }
 0x100   :  { %v1194_v36 = vpop.eup %1193 }
 0x101   :  { %v1196_v37 = vpop.eup %1195  ;;  %v336_v38 = vpack.c.bf16 %v1194_v36, %v1190_v33 }
 0x102   :  { %v1198_v40 = vpop.eup %1197  ;;  %v335_v41 = vpack.c.bf16 %v1196_v37, %v1192_v35 }
 0x103   :  { %v1200_v42 = vpop.eup %1199  ;;  %v341_v43 = vpack.c.bf16 %v1198_v40, %v1186_v31 }
 0x104   :  { %v1202_v44 = vpop.eup %1201  ;;  %1055 = vmatprep.mubr.bf16.mxu1 %v335_v41 }
 0x105   :  { %v1204_v62 = vpop.eup %1203  ;;  %1056 = vmatmul.mubr.bf16.gmra.mrb[28].mxu1 %v336_v38 }
 0x106   :  { %v1206_v45 = vpop.eup %1205  ;;  %1059 = vmatprep.mubr.bf16.mxu1 %v337_v6  ;;  %v344_v47 = vpack.c.bf16 %v1204_v62, %v1200_v42 }
 0x107   :  { %v343_v48 = vpack.c.bf16 %v1206_v45, %v1202_v44 }
 0x10d   :  { %1060 = vmatmul.mubr.bf16.gmra.mrb[32].mxu1 %v338_v50  ;;  %v1532_v50 = vld [vmem:[%s1704_s4] ss:$0 sm:$0xff] }
 0x10e   :  { %1063 = vmatprep.mubr.bf16.mxu1 %v339_v30 }
 0x115   :  { %1064 = vmatmul.mubr.bf16.gmra.mrb[36].mxu1 %v340_v15 }
 0x116   :  { %1067 = vmatprep.mubr.bf16.mxu1 %v341_v43 }
 0x11d   :  { %1068 = vmatmul.mubr.bf16.gmra.mrb[40].mxu1 %v342_v34 }
 0x11e   :  { %1071 = vmatprep.mubr.bf16.mxu1 %v343_v48 }
 0x125   :  { %1072 = vmatmul.mubr.bf16.gmra.mrb[44].mxu1 %v344_v47 }
 0x1c0   :  { %v1045_v52 = vpop.f32.mrb[16].mxu1 }
 0x1c1   :  { %v459_v53 = vadd.f32 %v1045_v52, %v1532_v50  ;;  %v450_v54 = vpop.f32.mrb[17].mxu1 }
 0x1c2   :  { %v451_v55 = vadd.f32 %v1532_v50, %v450_v54  ;;  %v1046_v56 = vpop.f32.mrb[18].mxu1 }
 0x1c3   :  { %1207 = vtanh.f32 %v459_v53  ;;  %v462_v57 = vadd.f32 %v1046_v56, %v1532_v50  ;;  %v453_v58 = vpop.f32.mrb[19].mxu1 }
 0x1c4   :  { %1209 = vtanh.f32 %v451_v55  ;;  %v454_v59 = vadd.f32 %v1532_v50, %v453_v58 }
 0x1c5   :  { %1211 = vtanh.f32 %v462_v57 }
 0x1c6   :  { %1213 = vtanh.f32 %v454_v59 }
 0x1c8   :  { %v1049_v60 = vpop.f32.mrb[20].mxu1 }
 0x1c9   :  { %v475_v61 = vadd.f32 %v1049_v60, %v1532_v50  ;;  %v466_v63 = vpop.f32.mrb[21].mxu1 }
 0x1ca   :  { %v467_v0 = vadd.f32 %v1532_v50, %v466_v63  ;;  %v1050_v1 = vpop.f32.mrb[22].mxu1 }
 0x1cb   :  { %1215 = vtanh.f32 %v475_v61  ;;  %v478_v2 = vadd.f32 %v1050_v1, %v1532_v50  ;;  %v469_v3 = vpop.f32.mrb[23].mxu1 }
 0x1cc   :  { %1217 = vtanh.f32 %v467_v0  ;;  %v470_v4 = vadd.f32 %v1532_v50, %v469_v3 }
 0x1cd   :  { %v1208_v5 = vpop.eup %1207  ;;  %1219 = vtanh.f32 %v478_v2 }
 0x1ce   :  { %v1210_v6 = vpop.eup %1209  ;;  %1221 = vtanh.f32 %v470_v4 }
 0x1cf   :  { %v1212_v7 = vpop.eup %1211 }
 0x1d0   :  { %v1214_v8 = vpop.eup %1213  ;;  %v1053_v9 = vpop.f32.mrb[24].mxu1  ;;  %v610_v10 = vpack.c.bf16 %v1212_v7, %v1208_v5 }
 0x1d1   :  { %v491_v11 = vadd.f32 %v1053_v9, %v1532_v50  ;;  %v482_v12 = vpop.f32.mrb[25].mxu1  ;;  %v609_v13 = vpack.c.bf16 %v1214_v8, %v1210_v6 }
 0x1d2   :  { %v483_v14 = vadd.f32 %v1532_v50, %v482_v12  ;;  %v1054_v15 = vpop.f32.mrb[26].mxu1 }
 0x1d3   :  { %1223 = vtanh.f32 %v491_v11  ;;  %v494_v16 = vadd.f32 %v1054_v15, %v1532_v50  ;;  %v485_v17 = vpop.f32.mrb[27].mxu1  ;;  %1091 = vmatprep.mubr.bf16.mxu0 %v609_v13 }
 0x1d4   :  { %1225 = vtanh.f32 %v483_v14  ;;  %v486_v18 = vadd.f32 %v1532_v50, %v485_v17  ;;  %1092 = vmatmul.mubr.bf16.vlgmr.msra.gmra.mrb[16].mxu0 %v610_v10 }
 0x1d5   :  { %v1216_v19 = vpop.eup %1215  ;;  %1227 = vtanh.f32 %v494_v16 }
 0x1d6   :  { %v1218_v20 = vpop.eup %1217  ;;  %1229 = vtanh.f32 %v486_v18 }
 0x1d7   :  { %v1220_v21 = vpop.eup %1219 }
 0x1d8   :  { %v1222_v22 = vpop.eup %1221  ;;  %v1057_v23 = vpop.f32.mrb[28].mxu1  ;;  %v612_v24 = vpack.c.bf16 %v1220_v21, %v1216_v19 }
 0x1d9   :  { %v507_v25 = vadd.f32 %v1057_v23, %v1532_v50  ;;  %v498_v26 = vpop.f32.mrb[29].mxu1  ;;  %v611_v27 = vpack.c.bf16 %v1222_v22, %v1218_v20 }
 0x1da   :  { %v499_v28 = vadd.f32 %v1532_v50, %v498_v26  ;;  %v1058_v29 = vpop.f32.mrb[30].mxu1 }
 0x1db   :  { %1231 = vtanh.f32 %v507_v25  ;;  %v510_v30 = vadd.f32 %v1058_v29, %v1532_v50  ;;  %v501_v31 = vpop.f32.mrb[31].mxu1  ;;  %1095 = vmatprep.mubr.bf16.mxu0 %v611_v27 }
 0x1dc   :  { %1233 = vtanh.f32 %v499_v28  ;;  %v502_v32 = vadd.f32 %v1532_v50, %v501_v31  ;;  %1096 = vmatmul.mubr.bf16.gmra.mrb[20].mxu0 %v612_v24 }
 0x1dd   :  { %v1224_v33 = vpop.eup %1223  ;;  %1235 = vtanh.f32 %v510_v30 }
 0x1de   :  { %v1226_v34 = vpop.eup %1225  ;;  %1237 = vtanh.f32 %v502_v32 }
 0x1df   :  { %v1228_v35 = vpop.eup %1227 }
 0x1e0   :  { %v1230_v36 = vpop.eup %1229  ;;  %v1061_v37 = vpop.f32.mrb[32].mxu1  ;;  %v614_v38 = vpack.c.bf16 %v1228_v35, %v1224_v33 }
 0x1e1   :  { %v523_v40 = vadd.f32 %v1061_v37, %v1532_v50  ;;  %v514_v41 = vpop.f32.mrb[33].mxu1  ;;  %v613_v42 = vpack.c.bf16 %v1230_v36, %v1226_v34 }
 0x1e2   :  { %v515_v43 = vadd.f32 %v1532_v50, %v514_v41  ;;  %v1062_v44 = vpop.f32.mrb[34].mxu1 }
 0x1e3   :  { %1239 = vtanh.f32 %v523_v40  ;;  %v526_v62 = vadd.f32 %v1062_v44, %v1532_v50  ;;  %v517_v45 = vpop.f32.mrb[35].mxu1  ;;  %1099 = vmatprep.mubr.bf16.mxu0 %v613_v42 }
 0x1e4   :  { %1241 = vtanh.f32 %v515_v43  ;;  %v518_v47 = vadd.f32 %v1532_v50, %v517_v45  ;;  %1100 = vmatmul.mubr.bf16.gmra.mrb[24].mxu0 %v614_v38 }
 0x1e5   :  { %v1232_v48 = vpop.eup %1231  ;;  %1243 = vtanh.f32 %v526_v62 }
 0x1e6   :  { %v1234_v49 = vpop.eup %1233  ;;  %1245 = vtanh.f32 %v518_v47 }
 0x1e7   :  { %v1236_v51 = vpop.eup %1235 }
 0x1e8   :  { %v1238_v39 = vpop.eup %1237  ;;  %v1065_v46 = vpop.f32.mrb[36].mxu1  ;;  %v616_v52 = vpack.c.bf16 %v1236_v51, %v1232_v48 }
 0x1e9   :  { %v539_v53 = vadd.f32 %v1065_v46, %v1532_v50  ;;  %v530_v54 = vpop.f32.mrb[37].mxu1  ;;  %v615_v55 = vpack.c.bf16 %v1238_v39, %v1234_v49 }
 0x1ea   :  { %v531_v56 = vadd.f32 %v1532_v50, %v530_v54  ;;  %v1066_v57 = vpop.f32.mrb[38].mxu1 }
 0x1eb   :  { %1247 = vtanh.f32 %v539_v53  ;;  %v542_v58 = vadd.f32 %v1066_v57, %v1532_v50  ;;  %v533_v59 = vpop.f32.mrb[39].mxu1  ;;  %1103 = vmatprep.mubr.bf16.mxu0 %v615_v55 }
 0x1ec   :  { %1249 = vtanh.f32 %v531_v56  ;;  %v534_v60 = vadd.f32 %v1532_v50, %v533_v59  ;;  %1104 = vmatmul.mubr.bf16.gmra.mrb[28].mxu0 %v616_v52 }
 0x1ed   :  { %v1240_v61 = vpop.eup %1239  ;;  %1251 = vtanh.f32 %v542_v58 }
 0x1ee   :  { %v1242_v63 = vpop.eup %1241  ;;  %1253 = vtanh.f32 %v534_v60 }
 0x1ef   :  { %v1244_v0 = vpop.eup %1243 }
 0x1f0   :  { %v1246_v1 = vpop.eup %1245  ;;  %v1069_v2 = vpop.f32.mrb[40].mxu1  ;;  %v618_v3 = vpack.c.bf16 %v1244_v0, %v1240_v61 }
 0x1f1   :  { %v555_v4 = vadd.f32 %v1069_v2, %v1532_v50  ;;  %v546_v5 = vpop.f32.mrb[41].mxu1  ;;  %v617_v6 = vpack.c.bf16 %v1246_v1, %v1242_v63 }
 0x1f2   :  { %v547_v7 = vadd.f32 %v1532_v50, %v546_v5  ;;  %v1070_v8 = vpop.f32.mrb[42].mxu1 }
 0x1f3   :  { %1255 = vtanh.f32 %v555_v4  ;;  %v558_v9 = vadd.f32 %v1070_v8, %v1532_v50  ;;  %v549_v10 = vpop.f32.mrb[43].mxu1  ;;  %1107 = vmatprep.mubr.bf16.mxu0 %v617_v6 }
 0x1f4   :  { %1257 = vtanh.f32 %v547_v7  ;;  %v550_v11 = vadd.f32 %v1532_v50, %v549_v10  ;;  %1108 = vmatmul.mubr.bf16.gmra.mrb[32].mxu0 %v618_v3 }
 0x1f5   :  { %v1248_v12 = vpop.eup %1247  ;;  %1259 = vtanh.f32 %v558_v9 }
 0x1f6   :  { %v1250_v13 = vpop.eup %1249  ;;  %1261 = vtanh.f32 %v550_v11 }
 0x1f7   :  { %v1252_v14 = vpop.eup %1251 }
 0x1f8   :  { %v1254_v15 = vpop.eup %1253  ;;  %v1073_v16 = vpop.f32.mrb[44].mxu1  ;;  %v620_v17 = vpack.c.bf16 %v1252_v14, %v1248_v12 }
 0x1f9   :  { %v571_v18 = vadd.f32 %v1073_v16, %v1532_v50  ;;  %v562_v19 = vpop.f32.mrb[45].mxu1  ;;  %v619_v20 = vpack.c.bf16 %v1254_v15, %v1250_v13 }
 0x1fa   :  { %v563_v21 = vadd.f32 %v1532_v50, %v562_v19  ;;  %v1074_v22 = vpop.f32.mrb[46].mxu1 }
 0x1fb   :  { %1263 = vtanh.f32 %v571_v18  ;;  %v574_v23 = vadd.f32 %v1074_v22, %v1532_v50  ;;  %v565_v24 = vpop.f32.mrb[47].mxu1  ;;  %1111 = vmatprep.mubr.bf16.mxu0 %v619_v20 }
 0x1fc   :  { %1265 = vtanh.f32 %v563_v21  ;;  %v566_v25 = vadd.f32 %v1532_v50, %v565_v24  ;;  %1112 = vmatmul.mubr.bf16.gmra.mrb[36].mxu0 %v620_v17  ;;  %v1569_v50 = vld [vmem:[%s1705_s6] ss:$0 sm:$0xff] }
 0x1fd   :  { %v1256_v26 = vpop.eup %1255  ;;  %1267 = vtanh.f32 %v574_v23 }
 0x1fe   :  { %v1258_v27 = vpop.eup %1257  ;;  %1269 = vtanh.f32 %v566_v25 }
 0x1ff   :  { %v1260_v28 = vpop.eup %1259 }
 0x200   :  { %v1262_v29 = vpop.eup %1261  ;;  %v622_v30 = vpack.c.bf16 %v1260_v28, %v1256_v26 }
 0x201   :  { %v621_v31 = vpack.c.bf16 %v1262_v29, %v1258_v27 }
 0x203   :  { %1115 = vmatprep.mubr.bf16.mxu0 %v621_v31 }
 0x204   :  { %1116 = vmatmul.mubr.bf16.gmra.mrb[40].mxu0 %v622_v30 }
 0x205   :  { %v1264_v32 = vpop.eup %1263 }
 0x206   :  { %v1266_v33 = vpop.eup %1265 }
 0x207   :  { %v1268_v34 = vpop.eup %1267 }
 0x208   :  { %v1270_v35 = vpop.eup %1269  ;;  %v624_v36 = vpack.c.bf16 %v1268_v34, %v1264_v32 }
 0x209   :  { %v623_v37 = vpack.c.bf16 %v1270_v35, %v1266_v33 }
 0x20b   :  { %1119 = vmatprep.mubr.bf16.mxu0 %v623_v37 }
 0x20c   :  { %1120 = vmatmul.mubr.bf16.gmra.mrb[44].mxu0 %v624_v36 }
 0x2a7   :  { %v1093_v38 = vpop.f32.mrb[16].mxu0 }
 0x2a8   :  { %v739_v40 = vadd.f32 %v1093_v38, %v1569_v50  ;;  %v730_v41 = vpop.f32.mrb[17].mxu0 }
 0x2a9   :  { %v731_v42 = vadd.f32 %v1569_v50, %v730_v41  ;;  %v1094_v43 = vpop.f32.mrb[18].mxu0 }
 0x2aa   :  { %859 = vst [vmem:[%s1706_s7 + $0x10] sm:$0xff] %v739_v40  ;;  %v742_v44 = vadd.f32 %v1094_v43, %v1569_v50  ;;  %v733_v62 = vpop.f32.mrb[19].mxu0 }
 0x2ab   :  { %857 = vst [vmem:[%s1706_s7] sm:$0xff] %v731_v42  ;;  %v734_v45 = vadd.f32 %v1569_v50, %v733_v62 }
 0x2ac   :  { %860 = vst [vmem:[%s1706_s7 + $0x18] sm:$0xff] %v742_v44 }
 0x2ad   :  { %858 = vst [vmem:[%s1706_s7 + $0x8] sm:$0xff] %v734_v45 }
 0x2af   :  { %v1097_v47 = vpop.f32.mrb[20].mxu0 }
 0x2b0   :  { %v755_v48 = vadd.f32 %v1097_v47, %v1569_v50  ;;  %v746_v49 = vpop.f32.mrb[21].mxu0 }
 0x2b1   :  { %v747_v51 = vadd.f32 %v1569_v50, %v746_v49  ;;  %v1098_v39 = vpop.f32.mrb[22].mxu0 }
 0x2b2   :  { %863 = vst [vmem:[%s1706_s7 + $0x30] sm:$0xff] %v755_v48  ;;  %v758_v46 = vadd.f32 %v1098_v39, %v1569_v50  ;;  %v749_v52 = vpop.f32.mrb[23].mxu0 }
 0x2b3   :  { %861 = vst [vmem:[%s1706_s7 + $0x20] sm:$0xff] %v747_v51  ;;  %v750_v53 = vadd.f32 %v1569_v50, %v749_v52 }
 0x2b4   :  { %864 = vst [vmem:[%s1706_s7 + $0x38] sm:$0xff] %v758_v46 }
 0x2b5   :  { %862 = vst [vmem:[%s1706_s7 + $0x28] sm:$0xff] %v750_v53 }
 0x2b7   :  { %v1101_v54 = vpop.f32.mrb[24].mxu0 }
 0x2b8   :  { %v771_v55 = vadd.f32 %v1101_v54, %v1569_v50  ;;  %v762_v56 = vpop.f32.mrb[25].mxu0 }
 0x2b9   :  { %v763_v57 = vadd.f32 %v1569_v50, %v762_v56  ;;  %v1102_v58 = vpop.f32.mrb[26].mxu0 }
 0x2ba   :  { %867 = vst [vmem:[%s1706_s7 + $0x50] sm:$0xff] %v771_v55  ;;  %v774_v59 = vadd.f32 %v1102_v58, %v1569_v50  ;;  %v765_v60 = vpop.f32.mrb[27].mxu0 }
 0x2bb   :  { %865 = vst [vmem:[%s1706_s7 + $0x40] sm:$0xff] %v763_v57  ;;  %v766_v61 = vadd.f32 %v1569_v50, %v765_v60 }
 0x2bc   :  { %868 = vst [vmem:[%s1706_s7 + $0x58] sm:$0xff] %v774_v59 }
 0x2bd   :  { %866 = vst [vmem:[%s1706_s7 + $0x48] sm:$0xff] %v766_v61 }
 0x2bf   :  { %v1105_v63 = vpop.f32.mrb[28].mxu0 }
 0x2c0   :  { %v787_v0 = vadd.f32 %v1105_v63, %v1569_v50  ;;  %v778_v1 = vpop.f32.mrb[29].mxu0 }
 0x2c1   :  { %v779_v2 = vadd.f32 %v1569_v50, %v778_v1  ;;  %v1106_v3 = vpop.f32.mrb[30].mxu0 }
 0x2c2   :  { %871 = vst [vmem:[%s1706_s7 + $0x70] sm:$0xff] %v787_v0  ;;  %v790_v4 = vadd.f32 %v1106_v3, %v1569_v50  ;;  %v781_v5 = vpop.f32.mrb[31].mxu0 }
 0x2c3   :  { %869 = vst [vmem:[%s1706_s7 + $0x60] sm:$0xff] %v779_v2  ;;  %v782_v6 = vadd.f32 %v1569_v50, %v781_v5 }
 0x2c4   :  { %872 = vst [vmem:[%s1706_s7 + $0x78] sm:$0xff] %v790_v4 }
 0x2c5   :  { %870 = vst [vmem:[%s1706_s7 + $0x68] sm:$0xff] %v782_v6 }
 0x2c7   :  { %v1109_v7 = vpop.f32.mrb[32].mxu0 }
 0x2c8   :  { %v803_v8 = vadd.f32 %v1109_v7, %v1569_v50  ;;  %v794_v9 = vpop.f32.mrb[33].mxu0 }
 0x2c9   :  { %v795_v10 = vadd.f32 %v1569_v50, %v794_v9  ;;  %v1110_v11 = vpop.f32.mrb[34].mxu0 }
 0x2ca   :  { %875 = vst [vmem:[%s1706_s7 + $0x90] sm:$0xff] %v803_v8  ;;  %v806_v12 = vadd.f32 %v1110_v11, %v1569_v50  ;;  %v797_v13 = vpop.f32.mrb[35].mxu0 }
 0x2cb   :  { %873 = vst [vmem:[%s1706_s7 + $0x80] sm:$0xff] %v795_v10  ;;  %v798_v14 = vadd.f32 %v1569_v50, %v797_v13 }
 0x2cc   :  { %876 = vst [vmem:[%s1706_s7 + $0x98] sm:$0xff] %v806_v12 }
 0x2cd   :  { %874 = vst [vmem:[%s1706_s7 + $0x88] sm:$0xff] %v798_v14 }
 0x2cf   :  { %v1113_v15 = vpop.f32.mrb[36].mxu0 }
 0x2d0   :  { %v819_v16 = vadd.f32 %v1113_v15, %v1569_v50  ;;  %v810_v17 = vpop.f32.mrb[37].mxu0 }
 0x2d1   :  { %v811_v18 = vadd.f32 %v1569_v50, %v810_v17  ;;  %v1114_v19 = vpop.f32.mrb[38].mxu0 }
 0x2d2   :  { %879 = vst [vmem:[%s1706_s7 + $0xb0] sm:$0xff] %v819_v16  ;;  %v822_v20 = vadd.f32 %v1114_v19, %v1569_v50  ;;  %v813_v21 = vpop.f32.mrb[39].mxu0 }
 0x2d3   :  { %877 = vst [vmem:[%s1706_s7 + $0xa0] sm:$0xff] %v811_v18  ;;  %v814_v22 = vadd.f32 %v1569_v50, %v813_v21 }
 0x2d4   :  { %880 = vst [vmem:[%s1706_s7 + $0xb8] sm:$0xff] %v822_v20 }
 0x2d5   :  { %878 = vst [vmem:[%s1706_s7 + $0xa8] sm:$0xff] %v814_v22 }
 0x2d7   :  { %v1117_v23 = vpop.f32.mrb[40].mxu0 }
 0x2d8   :  { %v835_v24 = vadd.f32 %v1117_v23, %v1569_v50  ;;  %v826_v25 = vpop.f32.mrb[41].mxu0 }
 0x2d9   :  { %v827_v26 = vadd.f32 %v1569_v50, %v826_v25  ;;  %v1118_v27 = vpop.f32.mrb[42].mxu0 }
 0x2da   :  { %883 = vst [vmem:[%s1706_s7 + $0xd0] sm:$0xff] %v835_v24  ;;  %v838_v28 = vadd.f32 %v1118_v27, %v1569_v50  ;;  %v829_v29 = vpop.f32.mrb[43].mxu0 }
 0x2db   :  { %881 = vst [vmem:[%s1706_s7 + $0xc0] sm:$0xff] %v827_v26  ;;  %v830_v30 = vadd.f32 %v1569_v50, %v829_v29 }
 0x2dc   :  { %884 = vst [vmem:[%s1706_s7 + $0xd8] sm:$0xff] %v838_v28 }
 0x2dd   :  { %882 = vst [vmem:[%s1706_s7 + $0xc8] sm:$0xff] %v830_v30 }
 0x2df   :  { %v1121_v31 = vpop.f32.mrb[44].mxu0 }
 0x2e0   :  { %v851_v32 = vadd.f32 %v1121_v31, %v1569_v50  ;;  %v842_v33 = vpop.f32.mrb[45].mxu0 }
 0x2e1   :  { %v843_v34 = vadd.f32 %v1569_v50, %v842_v33  ;;  %v1122_v35 = vpop.f32.mrb[46].mxu0 }
 0x2e2   :  { %887 = vst [vmem:[%s1706_s7 + $0xf0] sm:$0xff] %v851_v32  ;;  %v854_v36 = vadd.f32 %v1122_v35, %v1569_v50  ;;  %v845_v37 = vpop.f32.mrb[47].mxu0 }
 0x2e3   :  { %885 = vst [vmem:[%s1706_s7 + $0xe0] sm:$0xff] %v843_v34  ;;  %v846_v38 = vadd.f32 %v1569_v50, %v845_v37 }
 0x2e4   :  { %888 = vst [vmem:[%s1706_s7 + $0xf8] sm:$0xff] %v854_v36 }
 0x2e5   :  { %886 = vst [vmem:[%s1706_s7 + $0xe8] sm:$0xff] %v846_v38 }

</bundles_post_ra>
